<compile_context>
chip_gen: v7x
topology: tpu7x:2x2x1
jax: 0.10.0
libtpu: 0.0.40
codegen_flags: <defaults>
</compile_context>

<pallas_src>
import functools

import jax
import jax.numpy as jnp
from jax.experimental import pallas as pl
from jax.experimental.pallas import tpu as pltpu


def _round_up(n: int, m: int) -> int:
    return ((n + m - 1) // m) * m


def rnn_cell_kernel(x_ref, h_ref, wx_ref, wh_ref, b_ref, out_ref):
    """One (tm, tn) output tile of tanh(x @ Wx + h @ Wh + b).

    x_ref:  (tm, I_pad)  bf16    wx_ref: (I_pad, tn) bf16
    h_ref:  (tm, H_pad)  bf16    wh_ref: (H_pad, tn) bf16
    b_ref:  (1, tn)      f32     out_ref:(tm, tn)    f32
    """
    acc = jnp.dot(x_ref[...], wx_ref[...], preferred_element_type=jnp.float32)
    acc = acc + jnp.dot(h_ref[...], wh_ref[...], preferred_element_type=jnp.float32)
    acc = acc + b_ref[...]                    # broadcast over batch (f32 epilogue)
    out_ref[...] = jnp.tanh(acc).astype(out_ref.dtype)


def prepare_params(weight, bias, input_size, hidden_size,
                   compute_dtype=jnp.bfloat16):
    """Split / transpose / pad the PyTorch-layout Linear parameters ONCE.

    weight: (hidden_size, input_size + hidden_size)   -- nn.Linear layout
    bias:   (hidden_size,)
    Returns:
      w_x: (I_pad, H_pad) compute_dtype
      w_h: (H_pad, H_pad) compute_dtype
      b:   (1, H_pad)     float32
    Zero padding guarantees the padded rows/cols contribute nothing.
    """
    i_pad = _round_up(input_size, 128)
    h_pad = _round_up(hidden_size, 128)
    w_x = weight[:, :input_size].T.astype(compute_dtype)      # (I, H)
    w_h = weight[:, input_size:].T.astype(compute_dtype)      # (H, H)
    w_x_p = jnp.zeros((i_pad, h_pad), compute_dtype).at[:input_size, :hidden_size].set(w_x)
    w_h_p = jnp.zeros((h_pad, h_pad), compute_dtype).at[:hidden_size, :hidden_size].set(w_h)
    b_p = jnp.zeros((1, h_pad), jnp.float32).at[0, :hidden_size].set(bias.astype(jnp.float32))
    return w_x_p, w_h_p, b_p


@functools.partial(jax.jit,
                   static_argnames=("input_size", "hidden_size", "compute_dtype"))
def rnn_cell_forward(x, hidden, w_x_p, w_h_p, b_p, *,
                     input_size, hidden_size, compute_dtype=jnp.bfloat16):
    """One RNN cell step: tanh(Linear(cat(x, hidden))), via split-weight dots."""
    B = x.shape[0]
    i_pad, h_pad = w_x_p.shape

    # Sublane-dense batch: multiple of 16 for bf16 packing (8 for f32).
    sub = 16 if compute_dtype == jnp.bfloat16 else 8
    b_pad = _round_up(B, sub)

    x_p = jnp.zeros((b_pad, i_pad), compute_dtype).at[:B, :input_size].set(
        x.astype(compute_dtype))
    h_p = jnp.zeros((b_pad, h_pad), compute_dtype).at[:B, :hidden_size].set(
        hidden.astype(compute_dtype))

    # Lane-dense output tiles; no K reduction axis (K stays whole per tile, so
    # the bias+tanh epilogue can live in the kernel body).
    tm = 256 if b_pad % 256 == 0 else b_pad
    tn = 512 if h_pad % 512 == 0 else h_pad
    grid = (b_pad // tm, h_pad // tn)

    out = pl.pallas_call(
        rnn_cell_kernel,
        out_shape=jax.ShapeDtypeStruct((b_pad, h_pad), jnp.float32),
        grid_spec=pltpu.PrefetchScalarGridSpec(
            num_scalar_prefetch=0,
            grid=grid,
            in_specs=[
                pl.BlockSpec((tm, i_pad), lambda i, j: (i, 0)),   # x tile
                pl.BlockSpec((tm, h_pad), lambda i, j: (i, 0)),   # hidden tile
                pl.BlockSpec((i_pad, tn), lambda i, j: (0, j)),   # W_x tile
                pl.BlockSpec((h_pad, tn), lambda i, j: (0, j)),   # W_h tile
                pl.BlockSpec((1, tn), lambda i, j: (0, j)),       # bias tile
            ],
            out_specs=pl.BlockSpec((tm, tn), lambda i, j: (i, j)),
        ),
        compiler_params=pltpu.CompilerParams(
            # Independent output tiles -> shardable over v7x's 2 TensorCores.
            dimension_semantics=("parallel", "parallel"),
        ),
    )(x_p, h_p, w_x_p, w_h_p, b_p)

    # Strip lane/sublane padding; cast back to the caller's dtype.
    return out[:B, :hidden_size].astype(x.dtype)


if __name__ == "__main__":
    # Small shapes consistent with the module's forward:
    #   x: (batch, input_size), hidden: (batch, hidden_size)
    batch = 2
    input_size = 16
    hidden_size = 32

    key = jax.random.PRNGKey(0)
    kx, kw, kb = jax.random.split(key, 3)

    x = jax.random.normal(kx, (batch, input_size), dtype=jnp.float32)
    hidden0 = jnp.zeros((batch, hidden_size), dtype=jnp.float32)  # init_hidden() broadcast

    # Deterministic params (shapes from nn.Linear(input_size + hidden_size, hidden_size)).
    fan_in = input_size + hidden_size
    bound = 1.0 / (fan_in ** 0.5)
    weight = jax.random.uniform(kw, (hidden_size, fan_in), dtype=jnp.float32,
                                minval=-bound, maxval=bound)
    bias = jax.random.uniform(kb, (hidden_size,), dtype=jnp.float32,
                              minval=-bound, maxval=bound)

    # Parameter prep (split / transpose / pad / bf16-cast) ONCE, outside the step.
    w_x_p, w_h_p, b_p = prepare_params(weight, bias, input_size, hidden_size)

    new_hidden = rnn_cell_forward(x, hidden0, w_x_p, w_h_p, b_p,
                                  input_size=input_size, hidden_size=hidden_size)
    new_hidden = jax.block_until_ready(new_hidden)

    # Correctness check against a pure-JAX f32 reference of the PyTorch forward.
    combined = jnp.concatenate([x, hidden0], axis=1)
    ref = jnp.tanh(combined @ weight.T + bias)
    assert new_hidden.shape == (batch, hidden_size)
    # bf16 MXU inputs with f32 accumulation -> tolerance sized for bf16 mantissa.
    assert jnp.allclose(new_hidden, ref, atol=2e-2, rtol=2e-2), (
        float(jnp.max(jnp.abs(new_hidden - ref))))

    print("KERNEL_OK")
</pallas_src>

<mosaic_0001>
module attributes {stable_mosaic.version = 11 : i64} {
  func.func @rnn_cell_kernel(%arg0: i32, %arg1: i32, %arg2: memref<16x128xbf16, #tpu.memory_space<vmem>>, %arg3: memref<16x128xbf16, #tpu.memory_space<vmem>>, %arg4: memref<128x128xbf16, #tpu.memory_space<vmem>>, %arg5: memref<128x128xbf16, #tpu.memory_space<vmem>>, %arg6: memref<1x128xf32, #tpu.memory_space<vmem>>, %arg7: memref<16x128xf32, #tpu.memory_space<vmem>>) attributes {dimension_semantics = [#tpu.dimension_semantics<parallel>, #tpu.dimension_semantics<parallel>], iteration_bounds = array<i64: 1, 1>, scalar_prefetch = 0 : i64, scratch_operands = 0 : i64, tpu.core_type = #tpu.core_type<tc>, window_params = [{transform_indices = @transform_0, window_bounds = array<i64: 16, 128>}, {transform_indices = @transform_1, window_bounds = array<i64: 16, 128>}, {transform_indices = @transform_2, window_bounds = array<i64: 128, 128>}, {transform_indices = @transform_3, window_bounds = array<i64: 128, 128>}, {transform_indices = @transform_4, window_bounds = array<i64: 1, 128>}, {transform_indices = @transform_5, window_bounds = array<i64: 16, 128>}]} {
    %c0 = arith.constant 0 : index
    %c0_0 = arith.constant 0 : index
    %0 = vector.load %arg2[%c0, %c0_0] : memref<16x128xbf16, #tpu.memory_space<vmem>>, vector<16x128xbf16>
    %c0_1 = arith.constant 0 : index
    %c0_2 = arith.constant 0 : index
    %1 = vector.load %arg4[%c0_1, %c0_2] : memref<128x128xbf16, #tpu.memory_space<vmem>>, vector<128x128xbf16>
    %cst = arith.constant dense<0.000000e+00> : vector<16x128xf32>
    %2 = tpu.matmul %0, %1, %cst {dimension_numbers = #tpu.dot_dimension_numbers<[1], [0], [0], [1], [0, 0, 1, 1], [], []>} : vector<16x128xbf16>, vector<128x128xbf16>, vector<16x128xf32> -> vector<16x128xf32>
    %c0_3 = arith.constant 0 : index
    %c0_4 = arith.constant 0 : index
    %3 = vector.load %arg3[%c0_3, %c0_4] : memref<16x128xbf16, #tpu.memory_space<vmem>>, vector<16x128xbf16>
    %c0_5 = arith.constant 0 : index
    %c0_6 = arith.constant 0 : index
    %4 = vector.load %arg5[%c0_5, %c0_6] : memref<128x128xbf16, #tpu.memory_space<vmem>>, vector<128x128xbf16>
    %cst_7 = arith.constant dense<0.000000e+00> : vector<16x128xf32>
    %5 = tpu.matmul %3, %4, %cst_7 {dimension_numbers = #tpu.dot_dimension_numbers<[1], [0], [0], [1], [0, 0, 1, 1], [], []>} : vector<16x128xbf16>, vector<128x128xbf16>, vector<16x128xf32> -> vector<16x128xf32>
    %6 = arith.addf %2, %5 : vector<16x128xf32>
    %c0_8 = arith.constant 0 : index
    %c0_9 = arith.constant 0 : index
    %7 = vector.load %arg6[%c0_8, %c0_9] : memref<1x128xf32, #tpu.memory_space<vmem>>, vector<1x128xf32>
    %8 = vector.broadcast %7 : vector<1x128xf32> to vector<16x128xf32>
    %9 = arith.addf %6, %8 : vector<16x128xf32>
    %10 = math.tanh %9 : vector<16x128xf32>
    %c0_10 = arith.constant 0 : index
    %c0_11 = arith.constant 0 : index
    %11 = vector.load %arg7[%c0_10, %c0_11] : memref<16x128xf32, #tpu.memory_space<vmem>>, vector<16x128xf32>
    tpu.vector_store %arg7[%c0_10, %c0_11], %10 {strides = array<i32>} : memref<16x128xf32, #tpu.memory_space<vmem>>, vector<16x128xf32>,
    return
  }
  func.func @transform_0(%arg0: i32, %arg1: i32) -> (i32, i32) {
    %c0_i32 = arith.constant 0 : i32
    %c0_i32_0 = arith.constant 0 : i32
    return %arg0, %c0_i32 : i32, i32
  }
  func.func @transform_1(%arg0: i32, %arg1: i32) -> (i32, i32) {
    %c0_i32 = arith.constant 0 : i32
    %c0_i32_0 = arith.constant 0 : i32
    return %arg0, %c0_i32 : i32, i32
  }
  func.func @transform_2(%arg0: i32, %arg1: i32) -> (i32, i32) {
    %c0_i32 = arith.constant 0 : i32
    %c0_i32_0 = arith.constant 0 : i32
    return %c0_i32, %arg1 : i32, i32
  }
  func.func @transform_3(%arg0: i32, %arg1: i32) -> (i32, i32) {
    %c0_i32 = arith.constant 0 : i32
    %c0_i32_0 = arith.constant 0 : i32
    return %c0_i32, %arg1 : i32, i32
  }
  func.func @transform_4(%arg0: i32, %arg1: i32) -> (i32, i32) {
    %c0_i32 = arith.constant 0 : i32
    %c0_i32_0 = arith.constant 0 : i32
    return %c0_i32, %arg1 : i32, i32
  }
  func.func @transform_5(%arg0: i32, %arg1: i32) -> (i32, i32) {
    %c0_i32 = arith.constant 0 : i32
    return %arg0, %arg1 : i32, i32
  }
}

</mosaic_0001>

<bundles_post_ra>
// kernel: rnn_cell_forward.1
= control target key start
LH: loop header
LB: loop body
LE: loop exit
PB: predicated region body
PF: predicated region fallthrough
CT: control target
= control target key end

     0   :  { %10 = vsyncpa [#allocation3], 0  ;;  %s522_s0 = inlined_call_operand.vmem [shape: bf16[16,128], index: 0, kind: input, shape index: {}]   ;;  %s523_s1 = inlined_call_operand.vmem [shape: bf16[16,128], index: 1, kind: input, shape index: {}]   ;;  %s524_s2 = inlined_call_operand.hbm [shape: bf16[128,128], index: 2, kind: input, shape index: {}]   ;;  %s525_s3 = inlined_call_operand.hbm [shape: bf16[128,128], index: 3, kind: input, shape index: {}]   ;;  %s526_s4 = inlined_call_operand.vmem [shape: f32[1,128], index: 4, kind: input, shape index: {}]   ;;  %s527_s5 = inlined_call_operand.vmem [shape: f32[16,128], index: 5, kind: output, shape index: {}]  }
   0x1   :  { %11 = vsyncpa [#allocation5], 0  ;;  %s447_s18 = smov [#allocation2]   ;;  %s399_s22 = scalar_lea.hbm %s524_s2, 1024 }
   0x2   :  { %s21_s19 = sshll.u32 %s447_s18, 4  ;;  %p400_p0 = scmp.ne.s32.totalorder %s524_s2, %s399_s22  ;;  %s22_s19 = int_to_ptr.vmem [resolvable:$true] %s21_s19 }
   0x3   :  { %p403_p1 = scmp.lt.u32.totalorder %s399_s22, %s524_s2 }
   0x5   :  { %p405_p2 = pnand %p403_p1, %p400_p0 }
   0x7   :  { %408 = shalt.err (!%p405_p2)
}
   0x8   :  { %s409_s27 = scalar_lea.vmem %s22_s19, 1024  ;;  %p414_p4 = scmp.lt.s32.totalorder %s22_s19, %s22_s19 }
   0x9   :  { %p410_p3 = scmp.ne.s32.totalorder %s22_s19, %s409_s27  ;;  %p415_p5 = scmp.lt.s32.totalorder %s409_s27, %s409_s27 }
   0xb   :  { %p416_p6 = por %p415_p5, %p414_p4 }
   0xd   :  { %p417_p7 = pnand %p416_p6, %p410_p3 }
   0xf   :  { %420 = shalt.err (!%p417_p7)
}
  0x10   :  { %s448_s28 = smov 64   ;;  %s449_s29 = smov 4  }
  0x11   :  { %27 = dma.hbm_to_vmem [thread:$0]  %s524_s2, 1024, %s22_s19, [#allocation3], %s448_s28, %s448_s28, %s449_s29  }
  0x12   :  { %s450_s7 = smov [#allocation4]   ;;  %s421_s11 = scalar_lea.hbm %s525_s3, 1024 }
  0x13   :  { %s33_s8 = sshll.u32 %s450_s7, 4  ;;  %p422_p8 = scmp.ne.s32.totalorder %s525_s3, %s421_s11  ;;  %s34_s8 = int_to_ptr.vmem [resolvable:$true] %s33_s8 }
  0x14   :  { %p425_p9 = scmp.lt.u32.totalorder %s421_s11, %s525_s3 }
  0x16   :  { %p427_p10 = pnand %p425_p9, %p422_p8 }
  0x18   :  { %430 = shalt.err (!%p427_p10)
}
  0x19   :  { %s431_s16 = scalar_lea.vmem %s34_s8, 1024  ;;  %p436_p12 = scmp.lt.s32.totalorder %s34_s8, %s34_s8 }
  0x1a   :  { %p432_p11 = scmp.ne.s32.totalorder %s34_s8, %s431_s16  ;;  %p437_p13 = scmp.lt.s32.totalorder %s431_s16, %s431_s16 }
  0x1c   :  { %p438_p0 = por %p437_p13, %p436_p12 }
  0x1e   :  { %p439_p1 = pnand %p438_p0, %p432_p11 }
  0x20   :  { %442 = shalt.err (!%p439_p1)
}
  0x21   :  { %39 = dma.hbm_to_vmem [thread:$0]  %s525_s3, 1024, %s34_s8, [#allocation5], %s448_s28, %s448_s28, %s449_s29  }
  0x22   :  { %443 = dma.done.wait [#allocation3], 1024  }
  0x23   :  { %444 = vsyncadd [#allocation3], 4294966272 }
  0x24   :  { %445 = dma.done.wait [#allocation5], 1024  }
  0x25   :  { %446 = vsyncadd [#allocation5], 4294966272  ;;  %v451_v0 = vmov 0.0   ;;  %vm452_vm0 = vmmov 0   ;;  %v377_v1 = vld [vmem:[#allocation4] sm:$0xff]   ;;  %v379_v3 = vld [vmem:[#allocation4 + $0x8] sm:$0xff]  }
  0x26   :  { %331 = vmatprep.subr.bf16.mxu0 %v451_v0  ;;  %351 = vmatprep.subr.bf16.mxu1 %v451_v0  ;;  %v378_v2 = vld [vmem:[#allocation2] sm:$0xff]   ;;  %v380_v4 = vld [vmem:[#allocation2 + $0x8] sm:$0xff]   ;;  %v381_v5 = vld [vmem:[#allocation4 + $0x10] sm:$0xff]  }
  0x27   :  { %347 = vmatprep.mubr.msk.bf16.mxu0 %vm452_vm0, %v451_v0  ;;  %367 = vmatprep.mubr.msk.bf16.mxu1 %vm452_vm0, %v451_v0  ;;  %v382_v6 = vld [vmem:[#allocation2 + $0x10] sm:$0xff]   ;;  %v383_v7 = vld [vmem:[#allocation4 + $0x18] sm:$0xff]   ;;  %v385_v9 = vld [vmem:[#allocation4 + $0x20] sm:$0xff]  }
  0x28   :  { %332 = vmatpush3.bf16.msra.mxu0 %v377_v1  ;;  %352 = vmatpush3.bf16.msra.mxu1 %v378_v2  ;;  %v384_v8 = vld [vmem:[#allocation2 + $0x18] sm:$0xff]   ;;  %v386_v10 = vld [vmem:[#allocation2 + $0x20] sm:$0xff]   ;;  %v387_v11 = vld [vmem:[#allocation4 + $0x28] sm:$0xff]  }
  0x29   :  { %333 = vmatprep.subr.bf16.mxu0 %v451_v0  ;;  %353 = vmatprep.subr.bf16.mxu1 %v451_v0  ;;  %v388_v12 = vld [vmem:[#allocation2 + $0x28] sm:$0xff]   ;;  %v389_v13 = vld [vmem:[#allocation4 + $0x30] sm:$0xff]   ;;  %v391_v15 = vld [vmem:[#allocation4 + $0x38] sm:$0xff]  }
  0x2a   :  { %v390_v14 = vld [vmem:[#allocation2 + $0x30] sm:$0xff]   ;;  %v392_v16 = vld [vmem:[#allocation2 + $0x38] sm:$0xff]   ;;  %v393_v17 = vld [vmem:[%s523_s1] sm:$0xff]  }
  0x2b   :  { %v394_v18 = vld [vmem:[%s522_s0] sm:$0xff]  }
  0x2c   :  { %334 = vmatpush3.bf16.msra.mxu0 %v379_v3  ;;  %354 = vmatpush3.bf16.msra.mxu1 %v380_v4  ;;  %v312_v21 = vld [vmem:[%s526_s4] ss:$0 sm:$0xff] }
  0x2d   :  { %335 = vmatprep.subr.bf16.mxu0 %v451_v0  ;;  %355 = vmatprep.subr.bf16.mxu1 %v451_v0 }
  0x30   :  { %336 = vmatpush3.bf16.msra.mxu0 %v381_v5  ;;  %356 = vmatpush3.bf16.msra.mxu1 %v382_v6 }
  0x31   :  { %337 = vmatprep.subr.bf16.mxu0 %v451_v0  ;;  %357 = vmatprep.subr.bf16.mxu1 %v451_v0 }
  0x34   :  { %338 = vmatpush3.bf16.msra.mxu0 %v383_v7  ;;  %358 = vmatpush3.bf16.msra.mxu1 %v384_v8 }
  0x35   :  { %339 = vmatprep.subr.bf16.mxu0 %v451_v0  ;;  %359 = vmatprep.subr.bf16.mxu1 %v451_v0 }
  0x38   :  { %340 = vmatpush3.bf16.msra.mxu0 %v385_v9  ;;  %360 = vmatpush3.bf16.msra.mxu1 %v386_v10 }
  0x39   :  { %341 = vmatprep.subr.bf16.mxu0 %v451_v0  ;;  %361 = vmatprep.subr.bf16.mxu1 %v451_v0 }
  0x3c   :  { %342 = vmatpush3.bf16.msra.mxu0 %v387_v11  ;;  %362 = vmatpush3.bf16.msra.mxu1 %v388_v12 }
  0x3d   :  { %343 = vmatprep.subr.bf16.mxu0 %v451_v0  ;;  %363 = vmatprep.subr.bf16.mxu1 %v451_v0 }
  0x40   :  { %344 = vmatpush3.bf16.msra.mxu0 %v389_v13  ;;  %364 = vmatpush3.bf16.msra.mxu1 %v390_v14 }
  0x41   :  { %345 = vmatprep.subr.bf16.mxu0 %v451_v0  ;;  %365 = vmatprep.subr.bf16.mxu1 %v451_v0 }
  0x44   :  { %346 = vmatpush3.bf16.msra.mxu0 %v391_v15  ;;  %366 = vmatpush3.bf16.msra.mxu1 %v392_v16 }
  0x47   :  { %348 = vmatmul.mubr.bf16.vlgmr.msra.gmra.mrb[0].mxu0 %v393_v17  ;;  %368 = vmatmul.mubr.bf16.vlgmr.msra.gmra.mrb[0].mxu1 %v394_v18 }
 0x11a   :  { %v173_v19 = vpop.f32.mrb[0].mxu0  ;;  %v268_v20 = vpop.f32.mrb[0].mxu1 }
 0x11b   :  { %v349_v22 = vpop.f32.mrb[1].mxu0  ;;  %v269_v23 = vadd.f32 %v268_v20, %v173_v19  ;;  %v369_v24 = vpop.f32.mrb[1].mxu1 }
 0x11c   :  { %v176_v25 = vpop.f32.mrb[2].mxu0  ;;  %v271_v26 = vpop.f32.mrb[2].mxu1 }
 0x11d   :  { %v350_v27 = vpop.f32.mrb[3].mxu0  ;;  %v282_v28 = vadd.f32 %v312_v21, %v269_v23  ;;  %v272_v29 = vadd.f32 %v271_v26, %v176_v25  ;;  %v370_v30 = vpop.f32.mrb[3].mxu1 }
 0x11f   :  { %395 = vtanh.f32 %v282_v28  ;;  %v283_v31 = vadd.f32 %v312_v21, %v272_v29 }
 0x121   :  { %397 = vtanh.f32 %v283_v31 }
 0x129   :  { %v396_v32 = vpop.eup %395 }
 0x12a   :  { %286 = vst [vmem:[%s527_s5] sm:$0xff] %v396_v32 }
 0x12b   :  { %v398_v33 = vpop.eup %397 }
 0x12c   :  { %287 = vst [vmem:[%s527_s5 + $0x8] sm:$0xff] %v398_v33 }
 0x12d   :  { %292 = vsyncpa [#allocation3], 1 }
 0x12e   :  { %293 = vsyncpa [#allocation5], 1 }

</bundles_post_ra>
